<compile_context>
chip_gen: v7x
topology: tpu7x:2x2x1
jax: 0.10.0
libtpu: 0.0.40
codegen_flags: <defaults>
</compile_context>

<pallas_src>
import functools

import jax
import jax.numpy as jnp
import numpy as np
from jax.experimental import pallas as pl
from jax.experimental.pallas import tpu as pltpu


def _round_up(n, m):
    return ((n + m - 1) // m) * m


# ----------------------------------------------------------------------------- kernel
def policy_kernel(x_ref, w1_ref, b1_ref, w2_ref, b2_ref, wht_ref, bht_ref,
                  out_ref, *, action_dim):
    bf16 = jnp.bfloat16

    # fc1 + relu   (bf16 operands on the MXU, f32 accumulation / elementwise)
    h1 = jnp.dot(x_ref[...], w1_ref[...],
                 preferred_element_type=jnp.float32) + b1_ref[...]
    h1 = jnp.maximum(h1, 0.0)

    # fc2 + relu
    h2 = jnp.dot(h1.astype(bf16), w2_ref[...],
                 preferred_element_type=jnp.float32) + b2_ref[...]
    h2 = jnp.maximum(h2, 0.0)

    # Fused, transposed heads: wht is (2A_pad, H); contract both operands on H so the
    # result is (2A_pad, tb) -- only the useful head rows, batch on the lanes.
    head = jnp.einsum("ph,bh->pb", wht_ref[...], h2.astype(bf16),
                      preferred_element_type=jnp.float32) + bht_ref[...]

    row = jax.lax.broadcasted_iota(jnp.int32, head.shape, 0)
    is_mean = row < action_dim

    # Single exp over the tiny (2A_pad, tb) block:
    #   mean rows: sigmoid(h) = 1 / (1 + exp(-h))   (EUP exp + approx reciprocal)
    #   std  rows: exp(h)                           (log_std unclamped, like the ref)
    e = jnp.exp(jnp.where(is_mean, -head, head))
    out_ref[...] = jnp.where(is_mean, pl.reciprocal(1.0 + e, approx=True), e)


# ----------------------------------------------------------------------------- wrapper
def policy_forward(x, prepared_params, *, action_dim, block_b=1024):
    """Returns (mean, std) of the Normal distribution produced by the policy."""
    w1, b1, w2, b2, wht, bht = prepared_params
    B, S = x.shape
    H = w1.shape[1]
    P = wht.shape[0]          # padded fused-head rows: round_up(2*A, 8)
    A = action_dim

    # Cast activations to bf16 once, outside the pipelined loop.
    x = x.astype(jnp.bfloat16)

    # Batch tiling. The transposed output puts batch on the lanes, so a multi-tile grid
    # needs tb % 128 == 0; a single tile only needs tb % 8 == 0.
    Bp8 = _round_up(B, 8)
    if Bp8 <= 128:
        tb = Bp8                                           # single grid step
    else:
        blk = max(128, (block_b // 128) * 128)
        quarter = max(128, ((Bp8 // 4) // 128) * 128)      # >=4 tiles for v7x's 2 TCs
        tb = min(blk, quarter)
    Bp = _round_up(B, tb)
    if Bp != B:
        x = jnp.pad(x, ((0, Bp - B), (0, 0)))

    grid = (Bp // tb,)
    keep = lambda i: (0, 0)       # weights/biases stay VMEM-resident across batch tiles

    flops = 2 * Bp * (S * H + H * H + H * P)
    transcendentals = Bp * P                               # one exp per output element
    bytes_accessed = (
        Bp * S * 2                                         # x (bf16)
        + (S * H + H * H + P * H) * 2                      # bf16 weights
        + (2 * H + P) * 4                                  # f32 biases
        + P * Bp * 4                                       # narrow transposed output
    )

    out = pl.pallas_call(
        functools.partial(policy_kernel, action_dim=A),
        out_shape=jax.ShapeDtypeStruct((P, Bp), jnp.float32),
        grid_spec=pltpu.PrefetchScalarGridSpec(
            num_scalar_prefetch=0,
            grid=grid,
            in_specs=[
                pl.BlockSpec((tb, S), lambda i: (i, 0)),   # x (bf16): blocked on batch
                pl.BlockSpec((S, H), keep),                # w1 (bf16)
                pl.BlockSpec((1, H), keep),                # b1 (f32)
                pl.BlockSpec((H, H), keep),                # w2 (bf16)
                pl.BlockSpec((1, H), keep),                # b2 (f32)
                pl.BlockSpec((P, H), keep),                # fused head W^T (bf16)
                pl.BlockSpec((P, 1), keep),                # fused head b^T (f32)
            ],
            out_specs=pl.BlockSpec((P, tb), lambda i: (0, i)),
        ),
        compiler_params=pltpu.CompilerParams(
            dimension_semantics=("parallel",),
        ),
        cost_estimate=pl.CostEstimate(
            flops=flops,
            transcendentals=transcendentals,
            bytes_accessed=bytes_accessed,
        ),
    )(x, w1, b1, w2, b2, wht, bht)

    mean = out[:A, :B].T
    std = out[A:2 * A, :B].T
    return mean, std


# ----------------------------------------------------------------------------- params
def init_params(key, state_dim, action_dim, hidden=256):
    """Deterministic PyTorch-like init: U(-1/sqrt(fan_in), 1/sqrt(fan_in)), f32."""
    def linear(key, fan_in, fan_out):
        kw, kb = jax.random.split(key)
        bound = 1.0 / np.sqrt(fan_in)
        w = jax.random.uniform(kw, (fan_in, fan_out), jnp.float32, -bound, bound)
        b = jax.random.uniform(kb, (1, fan_out), jnp.float32, -bound, bound)
        return w, b

    k1, k2, k3, k4 = jax.random.split(key, 4)
    w1, b1 = linear(k1, state_dim, hidden)
    w2, b2 = linear(k2, hidden, hidden)
    wm, bm = linear(k3, hidden, action_dim)
    ws, bs = linear(k4, hidden, action_dim)
    return (w1, b1, w2, b2, wm, bm, ws, bs)


def prepare_params(raw_params):
    """Fuse mean/log_std heads, pad rows to a multiple of 8, store transposed, bf16 weights."""
    w1, b1, w2, b2, wm, bm, ws, bs = raw_params
    H, A = wm.shape
    P = _round_up(2 * A, 8)
    wh = jnp.concatenate([wm, ws], axis=1)            # (H, 2A)
    bh = jnp.concatenate([bm, bs], axis=1)            # (1, 2A)
    wht = jnp.pad(wh, ((0, 0), (0, P - 2 * A))).T     # (P, H)
    bht = jnp.pad(bh, ((0, 0), (0, P - 2 * A))).T     # (P, 1)
    bf16 = jnp.bfloat16
    prepared = (w1.astype(bf16), b1, w2.astype(bf16), b2, wht.astype(bf16), bht)
    return prepared, A


# ----------------------------------------------------------------------------- reference
def policy_forward_ref(x, raw_params):
    """Pure-JAX reference with the same bf16 matmul operands / f32 accumulation."""
    w1, b1, w2, b2, wm, bm, ws, bs = raw_params
    bf16 = jnp.bfloat16
    h1 = jnp.maximum(
        jnp.dot(x.astype(bf16), w1.astype(bf16),
                preferred_element_type=jnp.float32) + b1, 0.0)
    h2 = jnp.maximum(
        jnp.dot(h1.astype(bf16), w2.astype(bf16),
                preferred_element_type=jnp.float32) + b2, 0.0)
    mean = jax.nn.sigmoid(
        jnp.dot(h2.astype(bf16), wm.astype(bf16),
                preferred_element_type=jnp.float32) + bm)
    std = jnp.exp(
        jnp.dot(h2.astype(bf16), ws.astype(bf16),
                preferred_element_type=jnp.float32) + bs)
    return mean, std


# ----------------------------------------------------------------------------- main
if __name__ == "__main__":
    key = jax.random.PRNGKey(0)
    k_params, k_x = jax.random.split(key)

    batch = 2
    state_dim = 8
    action_dim = 4

    raw_params = init_params(k_params, state_dim, action_dim, hidden=256)
    prepared, A = prepare_params(raw_params)
    x = jax.random.normal(k_x, (batch, state_dim), jnp.float32)

    fwd = jax.jit(functools.partial(policy_forward, action_dim=A))
    mean, std = fwd(x, prepared)
    jax.block_until_ready((mean, std))

    mean_ref, std_ref = policy_forward_ref(x, raw_params)
    # Tolerances account for bf16 matmul operands and the EUP approx reciprocal sigmoid.
    np.testing.assert_allclose(np.asarray(mean), np.asarray(mean_ref),
                               rtol=2e-2, atol=2e-2)
    np.testing.assert_allclose(np.asarray(std), np.asarray(std_ref),
                               rtol=2e-2, atol=2e-2)

    # TODO(synk): torch.distributions.Normal construction/sampling is left to the caller;
    # the kernel returns (mean, std).

    print("KERNEL_OK")
</pallas_src>

<mosaic_0001>
module attributes {stable_mosaic.version = 11 : i64} {
  func.func @policy_kernel(%arg0: i32, %arg1: memref<8x8xbf16, #tpu.memory_space<vmem>>, %arg2: memref<8x256xbf16, #tpu.memory_space<vmem>>, %arg3: memref<1x256xf32, #tpu.memory_space<vmem>>, %arg4: memref<256x256xbf16, #tpu.memory_space<vmem>>, %arg5: memref<1x256xf32, #tpu.memory_space<vmem>>, %arg6: memref<8x256xbf16, #tpu.memory_space<vmem>>, %arg7: memref<8x1xf32, #tpu.memory_space<vmem>>, %arg8: memref<8x8xf32, #tpu.memory_space<vmem>>) attributes {dimension_semantics = [#tpu.dimension_semantics<parallel>], iteration_bounds = array<i64: 1>, scalar_prefetch = 0 : i64, scratch_operands = 0 : i64, tpu.core_type = #tpu.core_type<tc>, window_params = [{transform_indices = @transform_0, window_bounds = array<i64: 8, 8>}, {pipeline_mode = #tpu.pipeline_mode<synchronous>, transform_indices = @transform_1, window_bounds = array<i64: 8, 256>}, {pipeline_mode = #tpu.pipeline_mode<synchronous>, transform_indices = @transform_2, window_bounds = array<i64: 1, 256>}, {pipeline_mode = #tpu.pipeline_mode<synchronous>, transform_indices = @transform_3, window_bounds = array<i64: 256, 256>}, {pipeline_mode = #tpu.pipeline_mode<synchronous>, transform_indices = @transform_4, window_bounds = array<i64: 1, 256>}, {pipeline_mode = #tpu.pipeline_mode<synchronous>, transform_indices = @transform_5, window_bounds = array<i64: 8, 256>}, {pipeline_mode = #tpu.pipeline_mode<synchronous>, transform_indices = @transform_6, window_bounds = array<i64: 8, 1>}, {transform_indices = @transform_7, window_bounds = array<i64: 8, 8>}]} {
    %c0 = arith.constant 0 : index
    %c0_0 = arith.constant 0 : index
    %0 = vector.load %arg1[%c0, %c0_0] : memref<8x8xbf16, #tpu.memory_space<vmem>>, vector<8x8xbf16>
    %c0_1 = arith.constant 0 : index
    %c0_2 = arith.constant 0 : index
    %1 = vector.load %arg2[%c0_1, %c0_2] : memref<8x256xbf16, #tpu.memory_space<vmem>>, vector<8x256xbf16>
    %cst = arith.constant dense<0.000000e+00> : vector<8x256xf32>
    %2 = tpu.matmul %0, %1, %cst {dimension_numbers = #tpu.dot_dimension_numbers<[1], [0], [0], [1], [0, 0, 1, 1], [], []>} : vector<8x8xbf16>, vector<8x256xbf16>, vector<8x256xf32> -> vector<8x256xf32>
    %c0_3 = arith.constant 0 : index
    %c0_4 = arith.constant 0 : index
    %3 = vector.load %arg3[%c0_3, %c0_4] : memref<1x256xf32, #tpu.memory_space<vmem>>, vector<1x256xf32>
    %4 = vector.broadcast %3 : vector<1x256xf32> to vector<8x256xf32>
    %5 = arith.addf %2, %4 : vector<8x256xf32>
    %cst_5 = arith.constant 0.000000e+00 : f32
    %6 = vector.broadcast %cst_5 : f32 to vector<8x256xf32>
    %7 = arith.maximumf %5, %6 : vector<8x256xf32>
    %8 = arith.truncf %7 : vector<8x256xf32> to vector<8x256xbf16>
    %c0_6 = arith.constant 0 : index
    %c0_7 = arith.constant 0 : index
    %9 = vector.load %arg4[%c0_6, %c0_7] : memref<256x256xbf16, #tpu.memory_space<vmem>>, vector<256x256xbf16>
    %cst_8 = arith.constant dense<0.000000e+00> : vector<8x256xf32>
    %10 = tpu.matmul %8, %9, %cst_8 {dimension_numbers = #tpu.dot_dimension_numbers<[1], [0], [0], [1], [0, 0, 1, 1], [], []>} : vector<8x256xbf16>, vector<256x256xbf16>, vector<8x256xf32> -> vector<8x256xf32>
    %c0_9 = arith.constant 0 : index
    %c0_10 = arith.constant 0 : index
    %11 = vector.load %arg5[%c0_9, %c0_10] : memref<1x256xf32, #tpu.memory_space<vmem>>, vector<1x256xf32>
    %12 = vector.broadcast %11 : vector<1x256xf32> to vector<8x256xf32>
    %13 = arith.addf %10, %12 : vector<8x256xf32>
    %cst_11 = arith.constant 0.000000e+00 : f32
    %14 = vector.broadcast %cst_11 : f32 to vector<8x256xf32>
    %15 = arith.maximumf %13, %14 : vector<8x256xf32>
    %c0_12 = arith.constant 0 : index
    %c0_13 = arith.constant 0 : index
    %16 = vector.load %arg6[%c0_12, %c0_13] : memref<8x256xbf16, #tpu.memory_space<vmem>>, vector<8x256xbf16>
    %17 = arith.truncf %15 : vector<8x256xf32> to vector<8x256xbf16>
    "tpu.trace_start"() <{level = 10 : i32, message = "ph,bh->pb"}> : () -> ()
    %cst_14 = arith.constant dense<0.000000e+00> : vector<8x8xf32>
    %18 = tpu.matmul %16, %17, %cst_14 {dimension_numbers = #tpu.dot_dimension_numbers<[1], [1], [0], [0], [0, 0, 1, 0], [], []>} : vector<8x256xbf16>, vector<8x256xbf16>, vector<8x8xf32> -> vector<8x8xf32>
    "tpu.trace_stop"() : () -> ()
    %c0_15 = arith.constant 0 : index
    %c0_16 = arith.constant 0 : index
    %19 = vector.load %arg7[%c0_15, %c0_16] : memref<8x1xf32, #tpu.memory_space<vmem>>, vector<8x1xf32>
    %20 = vector.broadcast %19 : vector<8x1xf32> to vector<8x8xf32>
    %21 = arith.addf %18, %20 : vector<8x8xf32>
    %22 = tpu.iota {dimensions = array<i32: 0>} : vector<8x8xi32>
    %c4_i32 = arith.constant 4 : i32
    %23 = vector.broadcast %c4_i32 : i32 to vector<8x8xi32>
    %24 = arith.cmpi slt, %22, %23 : vector<8x8xi32>
    %cst_17 = arith.constant 0.000000e+00 : f32
    %25 = vector.broadcast %cst_17 : f32 to vector<8x8xf32>
    %26 = arith.subf %25, %21 : vector<8x8xf32>
    %27 = arith.select %24, %26, %21 : vector<8x8xi1>, vector<8x8xf32>
    %28 = math.exp %27 : vector<8x8xf32>
    %cst_18 = arith.constant 1.000000e+00 : f32
    %29 = vector.broadcast %cst_18 : f32 to vector<8x8xf32>
    %30 = arith.addf %29, %28 : vector<8x8xf32>
    %31 = tpu.reciprocal %30 {approx = true} : vector<8x8xf32> -> vector<8x8xf32>
    %32 = arith.select %24, %31, %28 : vector<8x8xi1>, vector<8x8xf32>
    %c0_19 = arith.constant 0 : index
    %c0_20 = arith.constant 0 : index
    %33 = vector.load %arg8[%c0_19, %c0_20] : memref<8x8xf32, #tpu.memory_space<vmem>>, vector<8x8xf32>
    tpu.vector_store %arg8[%c0_19, %c0_20], %32 {strides = array<i32>} : memref<8x8xf32, #tpu.memory_space<vmem>>, vector<8x8xf32>,
    return
  }
  func.func @transform_0(%arg0: i32) -> (i32, i32) {
    %c0_i32 = arith.constant 0 : i32
    %c0_i32_0 = arith.constant 0 : i32
    return %arg0, %c0_i32 : i32, i32
  }
  func.func @transform_1(%arg0: i32) -> (i32, i32) {
    %c0_i32 = arith.constant 0 : i32
    %c0_i32_0 = arith.constant 0 : i32
    %c0_i32_1 = arith.constant 0 : i32
    return %c0_i32, %c0_i32_0 : i32, i32
  }
  func.func @transform_2(%arg0: i32) -> (i32, i32) {
    %c0_i32 = arith.constant 0 : i32
    %c0_i32_0 = arith.constant 0 : i32
    %c0_i32_1 = arith.constant 0 : i32
    return %c0_i32, %c0_i32_0 : i32, i32
  }
  func.func @transform_3(%arg0: i32) -> (i32, i32) {
    %c0_i32 = arith.constant 0 : i32
    %c0_i32_0 = arith.constant 0 : i32
    %c0_i32_1 = arith.constant 0 : i32
    return %c0_i32, %c0_i32_0 : i32, i32
  }
  func.func @transform_4(%arg0: i32) -> (i32, i32) {
    %c0_i32 = arith.constant 0 : i32
    %c0_i32_0 = arith.constant 0 : i32
    %c0_i32_1 = arith.constant 0 : i32
    return %c0_i32, %c0_i32_0 : i32, i32
  }
  func.func @transform_5(%arg0: i32) -> (i32, i32) {
    %c0_i32 = arith.constant 0 : i32
    %c0_i32_0 = arith.constant 0 : i32
    %c0_i32_1 = arith.constant 0 : i32
    return %c0_i32, %c0_i32_0 : i32, i32
  }
  func.func @transform_6(%arg0: i32) -> (i32, i32) {
    %c0_i32 = arith.constant 0 : i32
    %c0_i32_0 = arith.constant 0 : i32
    %c0_i32_1 = arith.constant 0 : i32
    return %c0_i32, %c0_i32_0 : i32, i32
  }
  func.func @transform_7(%arg0: i32) -> (i32, i32) {
    %c0_i32 = arith.constant 0 : i32
    %c0_i32_0 = arith.constant 0 : i32
    return %c0_i32, %arg0 : i32, i32
  }
}

</mosaic_0001>

<bundles_post_ra>
// kernel: policy_forward.1
= control target key start
LH: loop header
LB: loop body
LE: loop exit
PB: predicated region body
PF: predicated region fallthrough
CT: control target
= control target key end

     0   :  { %12 = vsyncpa [#allocation3], 0  ;;  %s558_s24 = smov [#allocation2]   ;;  %s637_s0 = inlined_call_operand.vmem [shape: bf16[8,8], index: 0, kind: input, shape index: {}]   ;;  %s638_s1 = inlined_call_operand.vmem [shape: bf16[8,256], index: 1, kind: input, shape index: {}]   ;;  %s639_s2 = inlined_call_operand.vmem [shape: f32[1,256], index: 2, kind: input, shape index: {}]   ;;  %s640_s3 = inlined_call_operand.hbm [shape: bf16[256,256], index: 3, kind: input, shape index: {}]   ;;  %s641_s4 = inlined_call_operand.vmem [shape: f32[1,256], index: 4, kind: input, shape index: {}]   ;;  %s642_s5 = inlined_call_operand.vmem [shape: bf16[8,256], index: 5, kind: input, shape index: {}]   ;;  %s643_s6 = inlined_call_operand.vmem [shape: f32[8,1], index: 6, kind: input, shape index: {}]   ;;  %s644_s7 = inlined_call_operand.vmem [shape: f32[8,8], index: 7, kind: output, shape index: {}]  }
   0x1   :  { %s24_s25 = sshll.u32 %s558_s24, 4  ;;  %s534_s28 = scalar_lea.hbm %s640_s3, 4096  ;;  %s25_s25 = int_to_ptr.vmem [resolvable:$true] %s24_s25 }
   0x2   :  { %p535_p0 = scmp.ne.s32.totalorder %s640_s3, %s534_s28  ;;  %p538_p1 = scmp.lt.u32.totalorder %s534_s28, %s640_s3 }
   0x4   :  { %p540_p2 = pnand %p538_p1, %p535_p0 }
   0x6   :  { %543 = shalt.err (!%p540_p2)
}
   0x7   :  { %s544_s10 = scalar_lea.vmem %s25_s25, 4096  ;;  %p549_p4 = scmp.lt.s32.totalorder %s25_s25, %s25_s25 }
   0x8   :  { %p545_p3 = scmp.ne.s32.totalorder %s25_s25, %s544_s10  ;;  %p550_p5 = scmp.lt.s32.totalorder %s544_s10, %s544_s10 }
   0xa   :  { %p551_p6 = por %p550_p5, %p549_p4 }
   0xc   :  { %p552_p7 = pnand %p551_p6, %p545_p3 }
   0xe   :  { %555 = shalt.err (!%p552_p7)
}
   0xf   :  { %s559_s11 = smov 128   ;;  %s560_s12 = smov 8  }
  0x10   :  { %30 = dma.hbm_to_vmem [thread:$0]  %s640_s3, 4096, %s25_s25, [#allocation3], %s559_s11, %s559_s11, %s560_s12  }
  0x11   :  { %556 = dma.done.wait [#allocation3], 4096  }
  0x12   :  { %557 = vsyncadd [#allocation3], 4294963200  ;;  %v561_v0 = vmov 0   ;;  %v42_v1 = vld [vmem:[%s638_s1] sm:$0xff]  ;;  %vm64_vm0 = vcmask 1043456   ;;  %vm60_vm1 = vcmask 64512   ;;  %v45_v38 = vlaneseq }
  0x13   :  { %103 = vmatprep.mubr.bf16.mxu0 %v561_v0  ;;  %477 = vset.pattern.permute.xlu0 %v561_v0  ;;  %v436_v2 = vcombine.high %v42_v1, %v42_v1  ;;  %v435_v3 = vcombine.low %v42_v1, %v42_v1  ;;  %v480_v4 = vld [vmem:[#allocation2 + $0x4] ss:$8 sps:$4 sm:$0xff]   ;;  %v482_v5 = vld [vmem:[#allocation2] ss:$8 sps:$4 sm:$0xff]   ;;  %v483_v6 = vld [vmem:[#allocation2 + $0x14] ss:$8 sps:$4 sm:$0xff]  }
  0x14   :  { %320 = vmatprep.subr.bf16.mxu1 %v480_v4  ;;  %v41_v8 = vld [vmem:[%s637_s0] sm:$0xf]  ;;  %v485_v9 = vld [vmem:[#allocation2 + $0x10] ss:$8 sps:$4 sm:$0xff]   ;;  %v486_v10 = vld [vmem:[#allocation2 + $0x24] ss:$8 sps:$4 sm:$0xff]  }
  0x15   :  { %437 = vmatprep.subr.msk.bf16.mxu0 %vm64_vm0, %v436_v2  ;;  %v66_v7 = vsel %vm64_vm0, %v435_v3, 0  ;;  %321 = vmatpush1.bf16.msra.mxu1 %v482_v5  ;;  %v488_v11 = vld [vmem:[#allocation2 + $0x20] ss:$8 sps:$4 sm:$0xff]   ;;  %v489_v12 = vld [vmem:[#allocation2 + $0x34] ss:$8 sps:$4 sm:$0xff]   ;;  %v46_v39 = vshrl.u32 %v45_v38, 7 }
  0x16   :  { %72 = vmatpush1.bf16.msra.mxu0 %v66_v7  ;;  %322 = vmatprep.subr.bf16.mxu1 %v483_v6  ;;  %v491_v13 = vld [vmem:[#allocation2 + $0x30] ss:$8 sps:$4 sm:$0xff]   ;;  %v492_v14 = vld [vmem:[#allocation2 + $0x44] ss:$8 sps:$4 sm:$0xff]   ;;  %v494_v15 = vld [vmem:[#allocation2 + $0x40] ss:$8 sps:$4 sm:$0xff]  }
  0x17   :  { %v495_v16 = vld [vmem:[#allocation2 + $0x54] ss:$8 sps:$4 sm:$0xff]   ;;  %v497_v17 = vld [vmem:[#allocation2 + $0x50] ss:$8 sps:$4 sm:$0xff]   ;;  %v498_v18 = vld [vmem:[#allocation2 + $0x64] ss:$8 sps:$4 sm:$0xff]  }
  0x18   :  { %v500_v19 = vld [vmem:[#allocation2 + $0x60] ss:$8 sps:$4 sm:$0xff]   ;;  %v501_v20 = vld [vmem:[#allocation2 + $0x74] ss:$8 sps:$4 sm:$0xff]   ;;  %v503_v21 = vld [vmem:[#allocation2 + $0x70] ss:$8 sps:$4 sm:$0xff]  }
  0x19   :  { %438 = vmatmul.mubr.msk.bf16.vlgmr.msra.gmra.mrb[0].mxu0 %vm60_vm1, %v41_v8  ;;  %323 = vmatpush1.bf16.msra.mxu1 %v485_v9  ;;  %v504_v22 = vld [vmem:[#allocation2 + $0x84] ss:$8 sps:$4 sm:$0xff]   ;;  %v506_v23 = vld [vmem:[#allocation2 + $0x80] ss:$8 sps:$4 sm:$0xff]   ;;  %v507_v24 = vld [vmem:[#allocation2 + $0x94] ss:$8 sps:$4 sm:$0xff]  }
  0x1a   :  { %324 = vmatprep.subr.bf16.mxu1 %v486_v10  ;;  %v509_v25 = vld [vmem:[#allocation2 + $0x90] ss:$8 sps:$4 sm:$0xff]   ;;  %v510_v26 = vld [vmem:[#allocation2 + $0xa4] ss:$8 sps:$4 sm:$0xff]   ;;  %v512_v27 = vld [vmem:[#allocation2 + $0xa0] ss:$8 sps:$4 sm:$0xff]  }
  0x1b   :  { %v513_v28 = vld [vmem:[#allocation2 + $0xb4] ss:$8 sps:$4 sm:$0xff]   ;;  %v515_v29 = vld [vmem:[#allocation2 + $0xb0] ss:$8 sps:$4 sm:$0xff]   ;;  %v516_v30 = vld [vmem:[#allocation2 + $0xc4] ss:$8 sps:$4 sm:$0xff]  }
  0x1c   :  { %v518_v31 = vld [vmem:[#allocation2 + $0xc0] ss:$8 sps:$4 sm:$0xff]   ;;  %v519_v32 = vld [vmem:[#allocation2 + $0xd4] ss:$8 sps:$4 sm:$0xff]   ;;  %v521_v33 = vld [vmem:[#allocation2 + $0xd0] ss:$8 sps:$4 sm:$0xff]  }
  0x1d   :  { %325 = vmatpush1.bf16.msra.mxu1 %v488_v11  ;;  %v522_v34 = vld [vmem:[#allocation2 + $0xe4] ss:$8 sps:$4 sm:$0xff]   ;;  %v524_v35 = vld [vmem:[#allocation2 + $0xe0] ss:$8 sps:$4 sm:$0xff]   ;;  %v525_v36 = vld [vmem:[#allocation2 + $0xf4] ss:$8 sps:$4 sm:$0xff]  }
  0x1e   :  { %326 = vmatprep.subr.bf16.mxu1 %v489_v12  ;;  %v527_v37 = vld [vmem:[#allocation2 + $0xf0] ss:$8 sps:$4 sm:$0xff]   ;;  %v47_v40 = vsub.s32 0, %v46_v39  ;;  %v43_v41 = vld [vmem:[%s639_s2] sm:$0x3]  ;;  %v51_v42 = vsub.s32 1, %v46_v39 }
  0x1f   :  { %v363_v55 = vld [vmem:[%s642_s5] sm:$0xff]  ;;  %vm421_vm2 = vcmp.lt.s32.totalorder %v46_v39, 4 }
  0x20   :  { %v48_v43 = vrot.slane %v43_v41, %v47_v40  ;;  %v52_v44 = vrot.slane %v43_v41, %v51_v42  ;;  %v472_v56 = vcombine.high %v363_v55, %v363_v55  ;;  %v366_v57 = vld [vmem:[%s643_s6] sm:$0xff]  ;;  %v471_v7 = vcombine.low %v363_v55, %v363_v55 }
  0x21   :  { %327 = vmatpush1.bf16.msra.mxu1 %v491_v13  ;;  %369 = vperm.xlu0 %477, %v366_v57   ;;  %v148_v58 = vld [vmem:[%s641_s4] sm:$0x3] }
  0x22   :  { %328 = vmatprep.subr.bf16.mxu1 %v492_v14  ;;  %411 = vmatprep.mubr.bf16.mxu0 %v472_v56  ;;  %v153_v59 = vrot.slane %v148_v58, %v47_v40  ;;  %v157_v60 = vrot.slane %v148_v58, %v51_v42 }
  0x25   :  { %329 = vmatpush1.bf16.msra.mxu1 %v494_v15 }
  0x26   :  { %330 = vmatprep.subr.bf16.mxu1 %v495_v16 }
  0x29   :  { %331 = vmatpush1.bf16.msra.mxu1 %v497_v17 }
  0x2a   :  { %332 = vmatprep.subr.bf16.mxu1 %v498_v18 }
  0x2d   :  { %333 = vmatpush1.bf16.msra.mxu1 %v500_v19 }
  0x2e   :  { %334 = vmatprep.subr.bf16.mxu1 %v501_v20 }
  0x31   :  { %335 = vmatpush1.bf16.msra.mxu1 %v503_v21 }
  0x32   :  { %336 = vmatprep.subr.bf16.mxu1 %v504_v22 }
  0x35   :  { %337 = vmatpush1.bf16.msra.mxu1 %v506_v23 }
  0x36   :  { %338 = vmatprep.subr.bf16.mxu1 %v507_v24 }
  0x39   :  { %339 = vmatpush1.bf16.msra.mxu1 %v509_v25 }
  0x3a   :  { %340 = vmatprep.subr.bf16.mxu1 %v510_v26 }
  0x3d   :  { %341 = vmatpush1.bf16.msra.mxu1 %v512_v27 }
  0x3e   :  { %342 = vmatprep.subr.bf16.mxu1 %v513_v28 }
  0x41   :  { %343 = vmatpush1.bf16.msra.mxu1 %v515_v29 }
  0x42   :  { %344 = vmatprep.subr.bf16.mxu1 %v516_v30 }
  0x45   :  { %345 = vmatpush1.bf16.msra.mxu1 %v518_v31 }
  0x46   :  { %346 = vmatprep.subr.bf16.mxu1 %v519_v32 }
  0x49   :  { %347 = vmatpush1.bf16.msra.mxu1 %v521_v33 }
  0x4a   :  { %348 = vmatprep.subr.bf16.mxu1 %v522_v34 }
  0x4d   :  { %349 = vmatpush1.bf16.msra.mxu1 %v524_v35 }
  0x4e   :  { %350 = vmatprep.subr.bf16.mxu1 %v525_v36 }
  0x51   :  { %351 = vmatpush1.bf16.msra.mxu1 %v527_v37 }
  0xa0   :  { %v370_v8 = vpop.permute.xlu0 %369 }
  0xec   :  { %v105_v45 = vpop.f32.mrb[0].mxu0 }
  0xed   :  { %v106_v46 = vadd.f32 %v105_v45, %v48_v43  ;;  %v107_v47 = vpop.f32.mrb[1].mxu0 }
  0xee   :  { %v108_v48 = vadd.f32 %v107_v47, %v52_v44  ;;  %v109_v49 = vpop.f32.mrb[2].mxu0 }
  0xef   :  { %v112_v50 = vmax.f32 %v106_v46, 0.0  ;;  %v110_v51 = vpop.f32.mrb[3].mxu0 }
  0xf0   :  { %v113_v52 = vmax.f32 %v108_v48, 0.0 }
  0xf1   :  { %v114_v54 = vpack.c.bf16 %v112_v50, %v112_v50 }
  0xf2   :  { %v115_v53 = vpack.c.bf16 %v113_v52, %v113_v52 }
  0xf4   :  { %352 = vmatprep.mubr.bf16.mxu1 %v115_v53 }
  0xf5   :  { %353 = vmatmul.mubr.bf16.vlgmr.msra.gmra.mrb[0].mxu1 %v114_v54 }
 0x1c8   :  { %v354_v61 = vpop.f32.mrb[0].mxu1 }
 0x1c9   :  { %v355_v62 = vadd.f32 %v354_v61, %v153_v59  ;;  %v356_v63 = vpop.f32.mrb[1].mxu1 }
 0x1ca   :  { %v357_v0 = vadd.f32 %v356_v63, %v157_v60  ;;  %v358_v1 = vpop.f32.mrb[2].mxu1 }
 0x1cb   :  { %v361_v2 = vmax.f32 %v355_v62, 0.0  ;;  %v359_v3 = vpop.f32.mrb[3].mxu1 }
 0x1cc   :  { %v362_v4 = vmax.f32 %v357_v0, 0.0 }
 0x1cd   :  { %v364_v6 = vpack.c.bf16 %v361_v2, %v361_v2 }
 0x1ce   :  { %v365_v5 = vpack.c.bf16 %v362_v4, %v362_v4 }
 0x1d0   :  { %379 = vmatprep.subr.bf16.mxu0 %v365_v5 }
 0x1d1   :  { %380 = vmatpush1.bf16.xpose.msra.mxu0 %v364_v6 }
 0x1d8   :  { %412 = vmatmul.mubr.bf16.vlgmr.msra.gmra.mrb[4].mxu0 %v471_v7 }
 0x2ab   :  { %v413_v9 = vpop.f32.mrb[4].mxu0 }
 0x2ac   :  { %v414_v10 = vadd.f32 %v413_v9, %v370_v8  ;;  %v415_v11 = vpop.f32.mrb[5].mxu0 }
 0x2ad   :  { %v416_v12 = vpop.f32.mrb[6].mxu0 }
 0x2ae   :  { %v422_v13 = vsub.f32 0.0, %v414_v10  ;;  %v417_v14 = vpop.f32.mrb[7].mxu0 }
 0x2b0   :  { %v423_v15 = vsel %vm421_vm2, %v422_v13, %v414_v10 }
 0x2b1   :  { %v424_v16 = vmul.f32 1.442695, %v423_v15 }
 0x2b3   :  { %530 = vpow2.f32 %v424_v16 }
 0x2bd   :  { %v531_v17 = vpop.eup %530 }
 0x2be   :  { %v426_v18 = vadd.f32 1.0, %v531_v17 }
 0x2c0   :  { %532 = vrcp.f32 %v426_v18 }
 0x2ca   :  { %v533_v19 = vpop.eup %532 }
 0x2cb   :  { %v428_v20 = vsel %vm421_vm2, %v533_v19, %v531_v17 }
 0x2cc   :  { %429 = vst.msk [vmem:[%s644_s7] sm:$0xff] %vm60_vm1, %v428_v20 }
 0x2cd   :  { %434 = vsyncpa [#allocation3], 1 }

</bundles_post_ra>
